<compile_context>
chip_gen: v5e
topology: v5e:2x2
jax: 0.10.0
libtpu: 0.0.40
codegen_flags: <defaults>
</compile_context>

<pallas_src>
import jax
import jax.numpy as jnp
from jax.experimental import pallas as pl
from jax.experimental.pallas import tpu as pltpu

BN_EPS = 1e-5
H1, H2 = 400, 300          # logical hidden sizes (match the PyTorch module)
H1P, H2P = 512, 384        # lane-padded hidden sizes (multiples of 128)


# --------------------------------------------------------------------------
# Kernel
# --------------------------------------------------------------------------
def critic_kernel(s_ref, a_ref, w1s_ref, w1a_ref, bn_ref, w2_hbm, l2_ref,
                  b3_ref, out_ref, w2_vmem, w2_sem):
    # Kick off the W2 HBM -> VMEM copy immediately; it is the dominant weight
    # transfer and is hidden behind layer-1 + BatchNorm compute below.
    w2_cp = pltpu.make_async_copy(w2_hbm, w2_vmem, w2_sem)
    w2_cp.start()

    # cat([state, action], 1) @ W1  ==  state @ W1_s + action @ W1_a
    # bf16 x bf16 with f32 accumulation is the native fast MXU path.
    s = s_ref[...].astype(jnp.bfloat16)                         # [B, Ds]
    a = a_ref[...].astype(jnp.bfloat16)                         # [B, Da]
    h1 = (jnp.dot(s, w1s_ref[...], preferred_element_type=jnp.float32)
          + jnp.dot(a, w1a_ref[...], preferred_element_type=jnp.float32)
          + bn_ref[0:1, :])                                     # [B, H1P] f32

    # BatchNorm1d (training mode, biased batch var), single fused pass.
    inv_b = 1.0 / s.shape[0]
    mean = jnp.sum(h1, axis=0, keepdims=True) * inv_b           # [1, H1P]
    mean_sq = jnp.sum(h1 * h1, axis=0, keepdims=True) * inv_b   # [1, H1P]
    var = mean_sq - mean * mean
    h1n = (h1 - mean) * jax.lax.rsqrt(var + BN_EPS)
    h1n = h1n * bn_ref[1:2, :] + bn_ref[2:3, :]                 # gamma, beta
    h1n = jnp.maximum(h1n, 0.0)                                 # ReLU

    # Only now block on the W2 DMA (transfer overlapped with the work above).
    w2_cp.wait()

    # Linear(400, 300) + ReLU   (bf16 operands, f32 accumulate)
    h2 = jnp.dot(h1n.astype(jnp.bfloat16), w2_vmem[...],
                 preferred_element_type=jnp.float32)            # [B, H2P]
    h2 = jnp.maximum(h2 + l2_ref[0:1, :], 0.0)

    # Linear(300, 1): N=1 matmul replaced by VPU multiply + lane reduction.
    q = jnp.sum(h2 * l2_ref[1:2, :], axis=-1, keepdims=True) + b3_ref[0]
    out_ref[...] = q                                            # [B, 1]


# --------------------------------------------------------------------------
# Wrapper
# --------------------------------------------------------------------------
def critic_forward(state, action, kparams):
    """state: [B, state_dim], action: [B, action_dim] -> q: [B, 1]."""
    state = state.astype(jnp.float32)
    action = action.astype(jnp.float32)
    B = state.shape[0]
    D = state.shape[1] + action.shape[1]

    w1s, w1a, bn_slab, w2, l2_slab, b3 = kparams
    args = (state, action, w1s, w1a, bn_slab, w2, l2_slab, b3)

    vmem = pl.BlockSpec(memory_space=pltpu.MemorySpace.VMEM)
    smem = pl.BlockSpec(memory_space=pltpu.MemorySpace.SMEM)
    any_ = pl.BlockSpec(memory_space=pl.ANY)        # raw HBM ref (manual DMA)

    weight_bytes = (D * H1P + H1P * H2P) * 2               # bf16 weights
    other_bytes = 4 * (3 * H1P + 2 * H2P + 1 + B * (D + 1))
    cost = pl.CostEstimate(
        flops=2 * B * (D * H1P + H1P * H2P + H2P) + 12 * B * H1P,
        transcendentals=H1P,
        bytes_accessed=weight_bytes + other_bytes,
    )

    return pl.pallas_call(
        critic_kernel,
        out_shape=jax.ShapeDtypeStruct((B, 1), jnp.float32),
        in_specs=[vmem, vmem, vmem, vmem, vmem, any_, vmem, smem],
        out_specs=vmem,
        scratch_shapes=[
            pltpu.VMEM((H1P, H2P), jnp.bfloat16),   # W2 landing buffer
            pltpu.SemaphoreType.DMA(()),
        ],
        cost_estimate=cost,
    )(*args)


# --------------------------------------------------------------------------
# Parameters
# --------------------------------------------------------------------------
def init_params(key, state_dim, action_dim):
    """PyTorch-Linear-style init: U(-1/sqrt(fan_in), 1/sqrt(fan_in)), f32, unpadded."""
    d_in = state_dim + action_dim
    dims = [(d_in, H1), (H1, H2), (H2, 1)]
    keys = jax.random.split(key, 6)
    lin = []
    for i, (fi, fo) in enumerate(dims):
        bound = 1.0 / jnp.sqrt(jnp.float32(fi))
        w = jax.random.uniform(keys[2 * i], (fi, fo), jnp.float32, -bound, bound)
        b = jax.random.uniform(keys[2 * i + 1], (1, fo), jnp.float32, -bound, bound)
        lin.append((w, b))
    (w1, b1), (w2, b2), (w3, b3) = lin
    gamma = jnp.ones((1, H1), jnp.float32)   # BatchNorm1d weight
    beta = jnp.zeros((1, H1), jnp.float32)   # BatchNorm1d bias
    return (w1, b1, gamma, beta, w2, b2, w3, b3)


def prepare_params(params, state_dim, action_dim):
    """One-time prep: lane-pad 400->512 / 300->384, split W1, bf16 weights,
    pack small f32 vectors into two slabs, scalar b3 for SMEM."""
    w1, b1, gamma, beta, w2, b2, w3, b3 = params
    D = state_dim + action_dim

    w1p = jnp.zeros((D, H1P), jnp.float32).at[:, :H1].set(w1)
    w2p = jnp.zeros((H1P, H2P), jnp.float32).at[:H1, :H2].set(w2)

    bn_slab = jnp.zeros((3, H1P), jnp.float32)
    bn_slab = bn_slab.at[0, :H1].set(b1[0])        # bias1
    bn_slab = bn_slab.at[1, :H1].set(gamma[0])     # BN gamma (pad = 0)
    bn_slab = bn_slab.at[2, :H1].set(beta[0])      # BN beta

    l2_slab = jnp.zeros((2, H2P), jnp.float32)
    l2_slab = l2_slab.at[0, :H2].set(b2[0])        # bias2
    l2_slab = l2_slab.at[1, :H2].set(w3[:, 0])     # w3 as a lane row

    w1s = w1p[:state_dim].astype(jnp.bfloat16)
    w1a = w1p[state_dim:].astype(jnp.bfloat16)
    b3s = jnp.reshape(b3, (1,)).astype(jnp.float32)   # scalar, lives in SMEM

    return (w1s, w1a, bn_slab, w2p.astype(jnp.bfloat16), l2_slab, b3s)


# --------------------------------------------------------------------------
# Pure-JAX reference (same math / same bf16 dot boundaries as the kernel)
# --------------------------------------------------------------------------
def critic_ref(state, action, kparams):
    w1s, w1a, bn_slab, w2, l2_slab, b3 = kparams
    s = state.astype(jnp.bfloat16)
    a = action.astype(jnp.bfloat16)
    h1 = (jnp.dot(s, w1s, preferred_element_type=jnp.float32)
          + jnp.dot(a, w1a, preferred_element_type=jnp.float32)
          + bn_slab[0:1])
    inv_b = 1.0 / state.shape[0]
    mean = jnp.sum(h1, axis=0, keepdims=True) * inv_b
    mean_sq = jnp.sum(h1 * h1, axis=0, keepdims=True) * inv_b
    var = mean_sq - mean * mean
    h1n = (h1 - mean) * jax.lax.rsqrt(var + BN_EPS)
    h1n = jnp.maximum(h1n * bn_slab[1:2] + bn_slab[2:3], 0.0)
    h2 = jnp.dot(h1n.astype(jnp.bfloat16), w2,
                 preferred_element_type=jnp.float32)
    h2 = jnp.maximum(h2 + l2_slab[0:1], 0.0)
    return jnp.sum(h2 * l2_slab[1:2], axis=-1, keepdims=True) + b3[0]


if __name__ == "__main__":
    key = jax.random.PRNGKey(0)
    k_params, k_state, k_action = jax.random.split(key, 3)

    batch = 8
    state_dim = 8     # small synthetic dims (MountainCarContinuous would be 2 / 1)
    action_dim = 4

    params = init_params(k_params, state_dim, action_dim)
    kparams = prepare_params(params, state_dim, action_dim)

    state = jax.random.normal(k_state, (batch, state_dim), jnp.float32)
    action = jax.random.normal(k_action, (batch, action_dim), jnp.float32)

    q = critic_forward(state, action, kparams)
    jax.block_until_ready(q)

    q_ref = critic_ref(state, action, kparams)
    assert q.shape == (batch, 1)
    assert jnp.allclose(q, q_ref, atol=1e-2, rtol=1e-2), (q, q_ref)

    print("KERNEL_OK")
</pallas_src>

<mosaic_0001>
module attributes {stable_mosaic.version = 11 : i64} {
  func.func @critic_kernel(%arg0: memref<8x8xf32, #tpu.memory_space<vmem>>, %arg1: memref<8x4xf32, #tpu.memory_space<vmem>>, %arg2: memref<8x512xbf16, #tpu.memory_space<vmem>>, %arg3: memref<4x512xbf16, #tpu.memory_space<vmem>>, %arg4: memref<3x512xf32, #tpu.memory_space<vmem>>, %arg5: memref<512x384xbf16, #tpu.memory_space<any>>, %arg6: memref<2x384xf32, #tpu.memory_space<vmem>>, %arg7: memref<1xf32, #tpu.memory_space<smem>>, %arg8: memref<8x1xf32, #tpu.memory_space<vmem>>, %arg9: memref<512x384xbf16, #tpu.memory_space<vmem>>, %arg10: memref<!tpu.dma_semaphore, #tpu.memory_space<semaphore_mem>>) attributes {dimension_semantics = [], scalar_prefetch = 0 : i64, scratch_operands = 2 : i64, tpu.core_type = #tpu.core_type<tc>} {
    tpu.enqueue_dma source(%arg5 : memref<512x384xbf16, #tpu.memory_space<any>>) target(%arg9 : memref<512x384xbf16, #tpu.memory_space<vmem>>) target_semaphore(%arg10 : memref<!tpu.dma_semaphore, #tpu.memory_space<semaphore_mem>>)
    %c0 = arith.constant 0 : index
    %c0_0 = arith.constant 0 : index
    %0 = vector.load %arg0[%c0, %c0_0] : memref<8x8xf32, #tpu.memory_space<vmem>>, vector<8x8xf32>
    %1 = arith.truncf %0 : vector<8x8xf32> to vector<8x8xbf16>
    %c0_1 = arith.constant 0 : index
    %c0_2 = arith.constant 0 : index
    %2 = vector.load %arg1[%c0_1, %c0_2] : memref<8x4xf32, #tpu.memory_space<vmem>>, vector<8x4xf32>
    %3 = arith.truncf %2 : vector<8x4xf32> to vector<8x4xbf16>
    %c0_3 = arith.constant 0 : index
    %c0_4 = arith.constant 0 : index
    %4 = vector.load %arg2[%c0_3, %c0_4] : memref<8x512xbf16, #tpu.memory_space<vmem>>, vector<8x512xbf16>
    %cst = arith.constant dense<0.000000e+00> : vector<8x512xf32>
    %5 = tpu.matmul %1, %4, %cst {dimension_numbers = #tpu.dot_dimension_numbers<[1], [0], [0], [1], [0, 0, 1, 1], [], []>} : vector<8x8xbf16>, vector<8x512xbf16>, vector<8x512xf32> -> vector<8x512xf32>
    %c0_5 = arith.constant 0 : index
    %c0_6 = arith.constant 0 : index
    %6 = vector.load %arg3[%c0_5, %c0_6] : memref<4x512xbf16, #tpu.memory_space<vmem>>, vector<4x512xbf16>
    %cst_7 = arith.constant dense<0.000000e+00> : vector<8x512xf32>
    %7 = tpu.matmul %3, %6, %cst_7 {dimension_numbers = #tpu.dot_dimension_numbers<[1], [0], [0], [1], [0, 0, 1, 1], [], []>} : vector<8x4xbf16>, vector<4x512xbf16>, vector<8x512xf32> -> vector<8x512xf32>
    %8 = arith.addf %5, %7 : vector<8x512xf32>
    %c0_8 = arith.constant 0 : index
    %c0_9 = arith.constant 0 : index
    %9 = vector.load %arg4[%c0_8, %c0_9] : memref<3x512xf32, #tpu.memory_space<vmem>>, vector<1x512xf32>
    %10 = vector.broadcast %9 : vector<1x512xf32> to vector<8x512xf32>
    %11 = arith.addf %8, %10 : vector<8x512xf32>
    %cst_10 = arith.constant dense<0.000000e+00> : vector<512xf32>
    %12 = vector.multi_reduction <add>, %11, %cst_10 [0] : vector<8x512xf32> to vector<512xf32>
    %13 = vector.shape_cast %12 : vector<512xf32> to vector<1x512xf32>
    %cst_11 = arith.constant 1.250000e-01 : f32
    %14 = vector.broadcast %cst_11 : f32 to vector<1x512xf32>
    %15 = arith.mulf %13, %14 : vector<1x512xf32>
    %16 = arith.mulf %11, %11 : vector<8x512xf32>
    %cst_12 = arith.constant dense<0.000000e+00> : vector<512xf32>
    %17 = vector.multi_reduction <add>, %16, %cst_12 [0] : vector<8x512xf32> to vector<512xf32>
    %18 = vector.shape_cast %17 : vector<512xf32> to vector<1x512xf32>
    %cst_13 = arith.constant 1.250000e-01 : f32
    %19 = vector.broadcast %cst_13 : f32 to vector<1x512xf32>
    %20 = arith.mulf %18, %19 : vector<1x512xf32>
    %21 = arith.mulf %15, %15 : vector<1x512xf32>
    %22 = arith.subf %20, %21 : vector<1x512xf32>
    %23 = vector.broadcast %15 : vector<1x512xf32> to vector<8x512xf32>
    %24 = arith.subf %11, %23 : vector<8x512xf32>
    %cst_14 = arith.constant 9.99999974E-6 : f32
    %25 = vector.broadcast %cst_14 : f32 to vector<1x512xf32>
    %26 = arith.addf %22, %25 : vector<1x512xf32>
    %27 = math.rsqrt %26 : vector<1x512xf32>
    %28 = vector.broadcast %27 : vector<1x512xf32> to vector<8x512xf32>
    %29 = arith.mulf %24, %28 : vector<8x512xf32>
    %c1 = arith.constant 1 : index
    %c0_15 = arith.constant 0 : index
    %30 = vector.load %arg4[%c1, %c0_15] : memref<3x512xf32, #tpu.memory_space<vmem>>, vector<1x512xf32>
    %31 = vector.broadcast %30 : vector<1x512xf32> to vector<8x512xf32>
    %32 = arith.mulf %29, %31 : vector<8x512xf32>
    %c2 = arith.constant 2 : index
    %c0_16 = arith.constant 0 : index
    %33 = vector.load %arg4[%c2, %c0_16] : memref<3x512xf32, #tpu.memory_space<vmem>>, vector<1x512xf32>
    %34 = vector.broadcast %33 : vector<1x512xf32> to vector<8x512xf32>
    %35 = arith.addf %32, %34 : vector<8x512xf32>
    %cst_17 = arith.constant 0.000000e+00 : f32
    %36 = vector.broadcast %cst_17 : f32 to vector<8x512xf32>
    %37 = arith.maximumf %35, %36 : vector<8x512xf32>
    tpu.wait_dma2 semaphore(%arg10 : memref<!tpu.dma_semaphore, #tpu.memory_space<semaphore_mem>>) src(%arg5 : memref<512x384xbf16, #tpu.memory_space<any>>) dst(%arg9 : memref<512x384xbf16, #tpu.memory_space<vmem>>)
    %38 = arith.truncf %37 : vector<8x512xf32> to vector<8x512xbf16>
    %c0_18 = arith.constant 0 : index
    %c0_19 = arith.constant 0 : index
    %39 = vector.load %arg9[%c0_18, %c0_19] : memref<512x384xbf16, #tpu.memory_space<vmem>>, vector<512x384xbf16>
    %cst_20 = arith.constant dense<0.000000e+00> : vector<8x384xf32>
    %40 = tpu.matmul %38, %39, %cst_20 {dimension_numbers = #tpu.dot_dimension_numbers<[1], [0], [0], [1], [0, 0, 1, 1], [], []>} : vector<8x512xbf16>, vector<512x384xbf16>, vector<8x384xf32> -> vector<8x384xf32>
    %c0_21 = arith.constant 0 : index
    %c0_22 = arith.constant 0 : index
    %41 = vector.load %arg6[%c0_21, %c0_22] : memref<2x384xf32, #tpu.memory_space<vmem>>, vector<1x384xf32>
    %42 = vector.broadcast %41 : vector<1x384xf32> to vector<8x384xf32>
    %43 = arith.addf %40, %42 : vector<8x384xf32>
    %cst_23 = arith.constant 0.000000e+00 : f32
    %44 = vector.broadcast %cst_23 : f32 to vector<8x384xf32>
    %45 = arith.maximumf %43, %44 : vector<8x384xf32>
    %c1_24 = arith.constant 1 : index
    %c0_25 = arith.constant 0 : index
    %46 = vector.load %arg6[%c1_24, %c0_25] : memref<2x384xf32, #tpu.memory_space<vmem>>, vector<1x384xf32>
    %47 = vector.broadcast %46 : vector<1x384xf32> to vector<8x384xf32>
    %48 = arith.mulf %45, %47 : vector<8x384xf32>
    %cst_26 = arith.constant dense<0.000000e+00> : vector<8xf32>
    %49 = vector.multi_reduction <add>, %48, %cst_26 [1] : vector<8x384xf32> to vector<8xf32>
    %50 = vector.shape_cast %49 : vector<8xf32> to vector<8x1xf32>
    %c0_27 = arith.constant 0 : index
    %51 = memref.load %arg7[%c0_27] : memref<1xf32, #tpu.memory_space<smem>>
    %52 = vector.broadcast %51 : f32 to vector<8x1xf32>
    %53 = arith.addf %50, %52 : vector<8x1xf32>
    %c0_28 = arith.constant 0 : index
    %c0_29 = arith.constant 0 : index
    %54 = vector.load %arg8[%c0_28, %c0_29] : memref<8x1xf32, #tpu.memory_space<vmem>>, vector<8x1xf32>
    tpu.vector_store %arg8[%c0_28, %c0_29], %53 {strides = array<i32>} : memref<8x1xf32, #tpu.memory_space<vmem>>, vector<8x1xf32>,
    return
  }
}

</mosaic_0001>

<bundles_post_ra>
// kernel: tpu_custom_call.1
= control target key start
LH: loop header
LB: loop body
LE: loop exit
PB: predicated region body
PF: predicated region fallthrough
CT: control target
= control target key end

     0   :  { %14 = vsyncpa [#allocation6], 0  ;;  %s2092_s0 = inlined_call_operand.hbm [shape: f32[8,8], index: 0, kind: input, shape index: {}]   ;;  %s2093_s1 = inlined_call_operand.vmem [shape: f32[8,4], index: 1, kind: input, shape index: {}]   ;;  %s2094_s2 = inlined_call_operand.hbm [shape: bf16[8,512], index: 2, kind: input, shape index: {}]   ;;  %s2095_s3 = inlined_call_operand.hbm [shape: bf16[4,512], index: 3, kind: input, shape index: {}]   ;;  %s2096_s4 = inlined_call_operand.vmem [shape: f32[3,512], index: 4, kind: input, shape index: {}]   ;;  %s2097_s5 = inlined_call_operand.hbm [shape: bf16[512,384], index: 5, kind: input, shape index: {}]   ;;  %s2098_s6 = inlined_call_operand.hbm [shape: f32[2,384], index: 6, kind: input, shape index: {}]   ;;  %s2099_s7 = inlined_call_operand.<no memory space> [shape: f32[1], index: 7, kind: input, shape index: {}]   ;;  %s2100_s8 = inlined_call_operand.vmem [shape: f32[8,1], index: 8, kind: output, shape index: {}]  }
   0x1   :  { %15 = vsyncpa [#allocation8], 0  ;;  %s35_s29 = sshll.u32 %s2094_s2, 4  ;;  %s36_s29 = int_to_ptr.hbm [resolvable:$true] %s35_s29 }
   0x2   :  { %16 = vsyncpa [#allocation11], 0  ;;  %s1903_s30 = smov [#allocation7]   ;;  %s22_s12 = sshll.u32 %s2092_s0, 4  ;;  %s23_s12 = int_to_ptr.hbm [resolvable:$true] %s22_s12 }
   0x3   :  { %s37_s9 = sshll.u32 %s1903_s30, 4  ;;  %s1904_s13 = smov [#allocation5]   ;;  %s38_s9 = int_to_ptr.vmem [resolvable:$true] %s37_s9 }
   0x4   :  { %40 = dma.hbm_to_vmem [thread:$0]  %s36_s29, 256, %s38_s9, [#allocation8]  }
   0x5   :  { %s24_s14 = sshll.u32 %s1904_s13, 4  ;;  %s46_s17 = sshll.u32 %s2095_s3, 4  ;;  %s25_s14 = int_to_ptr.vmem [resolvable:$true] %s24_s14  ;;  %s47_s17 = int_to_ptr.hbm [resolvable:$true] %s46_s17 }
   0x6   :  { %27 = dma.hbm_to_vmem [thread:$0]  %s23_s12, 128, %s25_s14, [#allocation6]  }
   0x7   :  { %s59_s19 = sshll.u32 %s2098_s6, 4  ;;  %s1905_s20 = smov [#allocation9]   ;;  %s60_s19 = int_to_ptr.hbm [resolvable:$true] %s59_s19 }
   0x8   :  { %s48_s21 = sshll.u32 %s1905_s20, 4  ;;  %s1906_s0 = smov [#allocation10]   ;;  %s49_s21 = int_to_ptr.vmem [resolvable:$true] %s48_s21 }
   0x9   :  { %51 = dma.hbm_to_vmem [thread:$0]  %s47_s17, 128, %s49_s21, [#allocation8]  }
   0xa   :  { %s61_s22 = sshll.u32 %s1906_s0, 4  ;;  %s62_s22 = int_to_ptr.vmem [resolvable:$true] %s61_s22 }
   0xb   :  { %64 = dma.hbm_to_vmem [thread:$0]  %s60_s19, 96, %s62_s22, [#allocation11]  }
   0xc   :  { %1895 = dma.done.wait [#allocation6], 128  }
   0xd   :  { %1896 = vsyncadd [#allocation6], 4294967168 }
   0xe   :  { %1897 = dma.done.wait [#allocation8], 384  }
   0xf   :  { %1898 = vsyncadd [#allocation8], 4294966912 }
  0x10   :  { %1899 = dma.done.wait [#allocation11], 96  }
  0x11   :  { %1900 = vsyncadd [#allocation11], 4294967200  ;;  %v103_v0 = vld [vmem:[#allocation9] sm:$0xff]  ;;  %v102_v1 = vld [vmem:[#allocation7 + $0x8] sm:$0xff]  ;;  %vm189_vm0 = vcmask 1043456   ;;  %vm114_vm1 = vcmask 1041408  }
  0x12   :  { %105 = vst [vmem:[#allocation1] ss:$4 sm:$0xff] %v103_v0  ;;  %v179_v2 = vunpack.c.l.b16 %v102_v1  ;;  %v101_v3 = vld [vmem:[#allocation7] sm:$0xff]  ;;  %v180_v5 = vunpack.c.h.b16 %v102_v1  ;;  %v99_v9 = vld [vmem:[%s2093_s1] sm:$0xff]  ;;  %vm110_vm2 = vcmask 31744   ;;  %v97_v25 = vld [vmem:[#allocation5] sm:$0xff] }
  0x13   :  { %v177_v4 = vunpack.c.l.b16 %v101_v3  ;;  %v178_v7 = vunpack.c.h.b16 %v101_v3  ;;  %v100_v18 = vpack.c.bf16 %v99_v9, %v99_v9  ;;  %v98_v26 = vpack.c.bf16 %v97_v25, %v97_v25  ;;  %s91_s24 = sshll.u32 %s2097_s5, 4  ;;  %s1907_s25 = smov [#allocation2]   ;;  %v254_v33 = vld [vmem:[%s2096_s4] ss:$4 sm:$0xf]  ;;  %s92_s24 = int_to_ptr.hbm [resolvable:$true] %s91_s24 }
  0x14   :  { %v183_v8 = vpack.c.b16 %v179_v2, %v179_v2  ;;  %v184_v10 = vpack.c.b16 %v180_v5, %v180_v5  ;;  %vm185_vm3 = vcmask 64512   ;;  %s93_s26 = sshll.u32 %s1907_s25, 4  ;;  %v256_v35 = vperm.slane %v254_v33, 0  ;;  %s94_s26 = int_to_ptr.vmem [resolvable:$true] %s93_s26 }
  0x15   :  { %v181_v6 = vpack.c.b16 %v177_v4, %v177_v4  ;;  %v182_v14 = vpack.c.b16 %v178_v7, %v178_v7  ;;  %96 = dma.hbm_to_vmem [thread:$0]  %s92_s24, 12288, %s94_s26, [#allocation3]  ;;  %v257_v38 = vperm.slane %v254_v33, 1  ;;  %v258_v48 = vperm.slane %v254_v33, 2 }
  0x16   :  { %v197_v19 = vsel %vm189_vm0, %v183_v8, 0  ;;  %v200_v23 = vsel %vm189_vm0, %v184_v10, 0  ;;  %v259_v56 = vperm.slane %v254_v33, 3 }
  0x17   :  { %v191_v11 = vsel %vm189_vm0, %v181_v6, 0  ;;  %v194_v24 = vsel %vm189_vm0, %v182_v14, 0 }
  0x19   :  { %v106_v12 = vld.sshfl [vmem:[#allocation1] sm:$0xff pattern:$0x73625140]  ;;  %v107_v13 = vld.sshfl [vmem:[#allocation1 + $0x8] sm:$0xff pattern:$0x73625140] }
  0x1a   :  { %v115_v15 = vsel %vm114_vm1, %v106_v12, 0  ;;  %v117_v16 = vsel %vm114_vm1, %v107_v13, 0  ;;  %v108_v17 = vld.sshfl [vmem:[#allocation1 + $0x10] sm:$0xff pattern:$0x73625140] }
  0x1b   :  { %130 = vmatpush.bf16.msra.mxu0 %v115_v15  ;;  %143 = vmatpush.bf16.msra.mxu1 %v117_v16  ;;  %v119_v20 = vsel %vm114_vm1, %v108_v17, 0  ;;  %v109_v21 = vld.sshfl [vmem:[#allocation1 + $0x18] sm:$0xff pattern:$0x73625140] }
  0x1c   :  { %156 = vmatpush.bf16.msra.mxu2 %v119_v20  ;;  %v121_v22 = vsel %vm114_vm1, %v109_v21, 0 }
  0x1d   :  { %169 = vmatpush.bf16.msra.mxu3 %v121_v22 }
  0x1e   :  { %1271 = vmatmul.msk.bf16.vlgmr.msra.gmra.mxu0 %vm110_vm2, %v100_v18  ;;  %1272 = vmatmul.msk.bf16.vlgmr.msra.gmra.mxu1 %vm110_vm2, %v100_v18 }
  0x1f   :  { %209 = vmatpush.bf16.msrb.mxu0 %v191_v11  ;;  %1273 = vmatmul.msk.bf16.vlgmr.msra.gmra.mxu2 %vm110_vm2, %v100_v18 }
  0x20   :  { %235 = vmatpush.bf16.msrb.mxu2 %v197_v19  ;;  %1274 = vmatmul.msk.bf16.vlgmr.msra.gmra.mxu3 %vm110_vm2, %v100_v18 }
  0x21   :  { %248 = vmatpush.bf16.msrb.mxu3 %v200_v23  ;;  %222 = vmatpush.bf16.msrb.mxu1 %v194_v24 }
  0x2e   :  { %1275 = vmatmul.msk.bf16.vlgmr.msrb.gmra.mxu0 %vm185_vm3, %v98_v26  ;;  %1276 = vmatmul.msk.bf16.vlgmr.msrb.gmra.mxu1 %vm185_vm3, %v98_v26 }
  0x2f   :  { %1277 = vmatmul.msk.bf16.vlgmr.msrb.gmra.mxu2 %vm185_vm3, %v98_v26 }
  0x30   :  { %1278 = vmatmul.msk.bf16.vlgmr.msrb.gmra.mxu3 %vm185_vm3, %v98_v26 }
  0x9b   :  { %v132_v27 = vpop.f32.mrf.mxu0  ;;  %v145_v28 = vpop.f32.mrf.mxu1 }
  0xa2   :  { %v158_v29 = vpop.f32.mrf.mxu2 }
  0xa3   :  { %v171_v30 = vpop.f32.mrf.mxu3  ;;  %v134_v31 = vpop.f32.mrf.mxu0 }
  0xa4   :  { %v147_v32 = vpop.f32.mrf.mxu1 }
  0xaa   :  { %v160_v34 = vpop.f32.mrf.mxu2 }
  0xab   :  { %v173_v36 = vpop.f32.mrf.mxu3  ;;  %v211_v37 = vpop.f32.mrf.mxu0 }
  0xac   :  { %v212_v39 = vadd.f32 %v211_v37, %v132_v27  ;;  %v224_v40 = vpop.f32.mrf.mxu1 }
  0xad   :  { %v225_v41 = vadd.f32 %v224_v40, %v145_v28 }
  0xae   :  { %v1982_v42 = vadd.f32 %v256_v35, %v212_v39 }
  0xaf   :  { %v1984_v43 = vadd.f32 %v257_v38, %v225_v41 }
  0xb0   :  { %v268_v44 = vrot.slane %v1982_v42, 4  ;;  %v296_v45 = vmul.f32 %v1982_v42, %v1982_v42 }
  0xb1   :  { %v274_v46 = vrot.slane %v1984_v43, 4  ;;  %v297_v47 = vmul.f32 %v1984_v43, %v1984_v43 }
  0xb2   :  { %v269_v49 = vadd.f32 %v268_v44, %v1982_v42  ;;  %v300_v50 = vrot.slane %v296_v45, 4  ;;  %v237_v51 = vpop.f32.mrf.mxu2 }
  0xb3   :  { %v275_v52 = vadd.f32 %v274_v46, %v1984_v43  ;;  %v306_v53 = vrot.slane %v297_v47, 4  ;;  %v238_v54 = vadd.f32 %v237_v51, %v158_v29  ;;  %v250_v55 = vpop.f32.mrf.mxu3  ;;  %v213_v57 = vpop.f32.mrf.mxu0 }
  0xb4   :  { %v270_v58 = vrot.slane %v269_v49, 2  ;;  %v301_v59 = vadd.f32 %v300_v50, %v296_v45  ;;  %v251_v60 = vadd.f32 %v250_v55, %v171_v30  ;;  %v226_v61 = vpop.f32.mrf.mxu1 }
  0xb5   :  { %v276_v62 = vrot.slane %v275_v52, 2  ;;  %v307_v63 = vadd.f32 %v306_v53, %v297_v47  ;;  %v1994_v0 = vadd.f32 %v258_v48, %v238_v54 }
  0xb6   :  { %v271_v1 = vadd.f32 %v270_v58, %v269_v49  ;;  %v302_v2 = vrot.slane %v301_v59, 2  ;;  %v1997_v6 = vadd.f32 %v259_v56, %v251_v60 }
  0xb7   :  { %v277_v3 = vadd.f32 %v276_v62, %v275_v52  ;;  %v308_v4 = vrot.slane %v307_v63, 2  ;;  %v280_v5 = vrot.slane %v1994_v0, 4  ;;  %v298_v9 = vmul.f32 %v1994_v0, %v1994_v0 }
  0xb8   :  { %v272_v7 = vrot.slane %v271_v1, 1  ;;  %v303_v8 = vadd.f32 %v302_v2, %v301_v59  ;;  %v286_v20 = vrot.slane %v1997_v6, 4  ;;  %v299_v25 = vmul.f32 %v1997_v6, %v1997_v6 }
  0xb9   :  { %v278_v10 = vrot.slane %v277_v3, 1  ;;  %v309_v11 = vadd.f32 %v308_v4, %v307_v63  ;;  %v281_v12 = vadd.f32 %v280_v5, %v1994_v0  ;;  %v312_v15 = vrot.slane %v298_v9, 4 }
  0xba   :  { %v273_v13 = vadd.f32 %v272_v7, %v271_v1  ;;  %v304_v14 = vrot.slane %v303_v8, 1  ;;  %v239_v16 = vpop.f32.mrf.mxu2  ;;  %v287_v29 = vadd.f32 %v286_v20, %v1997_v6  ;;  %v318_v41 = vrot.slane %v299_v25, 4 }
  0xbb   :  { %v279_v17 = vadd.f32 %v278_v10, %v277_v3  ;;  %v310_v18 = vrot.slane %v309_v11, 1  ;;  %v282_v19 = vrot.slane %v281_v12, 2  ;;  %v252_v21 = vpop.f32.mrf.mxu3  ;;  %v313_v24 = vadd.f32 %v312_v15, %v298_v9 }
  0xbc   :  { %v2003_v22 = vmul.f32 0.125, %v273_v13  ;;  %v305_v23 = vadd.f32 %v304_v14, %v303_v8  ;;  %v288_v40 = vrot.slane %v287_v29, 2  ;;  %v319_v49 = vadd.f32 %v318_v41, %v299_v25  ;;  %v2025_v8 = vld [vmem:[%s2096_s4 + $0x1] ss:$4 sm:$0xf] }
  0xbd   :  { %v2007_v26 = vmul.f32 0.125, %v279_v17  ;;  %v311_v27 = vadd.f32 %v310_v18, %v309_v11  ;;  %v283_v28 = vadd.f32 %v282_v19, %v281_v12  ;;  %v314_v32 = vrot.slane %v313_v24, 2  ;;  %v1280_v17 = vld [vmem:[%s2096_s4 + $0x2] ss:$4 sm:$0xf] }
  0xbe   :  { %v324_v30 = vmul.f32 0.125, %v305_v23  ;;  %v328_v31 = vmul.f32 %v2003_v22, %v2003_v22  ;;  %v289_v48 = vadd.f32 %v288_v40, %v287_v29  ;;  %v320_v54 = vrot.slane %v319_v49, 2 }
  0xbf   :  { %v325_v33 = vmul.f32 0.125, %v311_v27  ;;  %v329_v34 = vmul.f32 %v2007_v26, %v2007_v26  ;;  %v284_v35 = vrot.slane %v283_v28, 1  ;;  %v315_v37 = vadd.f32 %v314_v32, %v313_v24 }
  0xc0   :  { %v332_v36 = vsub.f32 %v324_v30, %v328_v31  ;;  %v290_v53 = vrot.slane %v289_v48, 1  ;;  %v321_v57 = vadd.f32 %v320_v54, %v319_v49  ;;  %v391_v14 = vperm.slane %v2025_v8, 0 }
  0xc1   :  { %v333_v38 = vsub.f32 %v325_v33, %v329_v34  ;;  %v285_v39 = vadd.f32 %v284_v35, %v283_v28  ;;  %v316_v45 = vrot.slane %v315_v37, 1  ;;  %v336_v20 = vsub.f32 %v1982_v42, %v2003_v22 }
  0xc2   :  { %v340_v44 = vadd.f32 1e-05, %v332_v36  ;;  %v291_v56 = vadd.f32 %v290_v53, %v289_v48  ;;  %v322_v61 = vrot.slane %v321_v57, 1  ;;  %v392_v23 = vperm.slane %v2025_v8, 1 }
  0xc3   :  { %v341_v46 = vadd.f32 1e-05, %v333_v38  ;;  %v2014_v47 = vmul.f32 0.125, %v285_v39  ;;  %v317_v50 = vadd.f32 %v316_v45, %v315_v37  ;;  %v337_v25 = vsub.f32 %v1984_v43, %v2007_v26 }
  0xc4   :  { %1767 = vrsqrt.f32 %v340_v44  ;;  %v2018_v60 = vmul.f32 0.125, %v291_v56  ;;  %v323_v3 = vadd.f32 %v322_v61, %v321_v57  ;;  %vm350_vm6 = vweird.f32 %v340_v44 }
  0xc5   :  { %1769 = vrsqrt.f32 %v341_v46  ;;  %v330_v51 = vmul.f32 %v2014_v47, %v2014_v47  ;;  %v326_v52 = vmul.f32 0.125, %v317_v50  ;;  %vm360_vm8 = vweird.f32 %v341_v46 }
  0xc6   :  { %v331_v4 = vmul.f32 %v2018_v60, %v2018_v60  ;;  %v327_v9 = vmul.f32 0.125, %v323_v3  ;;  %v406_v29 = vperm.slane %v1280_v17, 0  ;;  %v407_v32 = vperm.slane %v1280_v17, 1 }
  0xc7   :  { %v334_v55 = vsub.f32 %v326_v52, %v330_v51  ;;  %v338_v26 = vsub.f32 %v1994_v0, %v2014_v47  ;;  %v393_v39 = vperm.slane %v2025_v8, 2  ;;  %v339_v0 = vsub.f32 %v1997_v6, %v2018_v60 }
  0xc8   :  { %v335_v12 = vsub.f32 %v327_v9, %v331_v4  ;;  %v394_v47 = vperm.slane %v2025_v8, 3  ;;  %v409_v57 = vperm.slane %v1280_v17, 3 }
  0xc9   :  { %v342_v59 = vadd.f32 1e-05, %v334_v55 }
  0xca   :  { %v1768_v58 = vpop.eup %1767  ;;  %v343_v19 = vadd.f32 1e-05, %v335_v12 }
  0xcb   :  { %v1770_v62 = vpop.eup %1769  ;;  %v345_v63 = vmul.f32 %v1768_v58, %v340_v44  ;;  %1771 = vrsqrt.f32 %v342_v59  ;;  %vm351_vm4 = vweird.f32 %v1768_v58  ;;  %vm370_vm11 = vweird.f32 %v342_v59 }
  0xcc   :  { %v355_v1 = vmul.f32 %v1770_v62, %v341_v46  ;;  %vm361_vm5 = vweird.f32 %v1770_v62  ;;  %vm352_vm7 = vmor %vm350_vm6, %vm351_vm4  ;;  %1773 = vrsqrt.f32 %v343_v19  ;;  %v408_v46 = vperm.slane %v1280_v17, 2 }
  0xcd   :  { %v346_v2 = vmul.f32 %v1768_v58, %v345_v63  ;;  %vm362_vm9 = vmor %vm360_vm8, %vm361_vm5  ;;  %vm380_vm14 = vweird.f32 %v343_v19 }
  0xce   :  { %v356_v5 = vmul.f32 %v1770_v62, %v355_v1 }
  0xcf   :  { %v347_v7 = vmul.f32 0.5, %v346_v2 }
  0xd0   :  { %v357_v10 = vmul.f32 0.5, %v356_v5 }
  0xd1   :  { %v348_v11 = vsub.f32 1.5, %v347_v7  ;;  %v1772_v13 = vpop.eup %1771 }
  0xd2   :  { %v358_v15 = vsub.f32 1.5, %v357_v10  ;;  %v365_v18 = vmul.f32 %v1772_v13, %v342_v59  ;;  %vm371_vm10 = vweird.f32 %v1772_v13  ;;  %v1774_v36 = vpop.eup %1773 }
  0xd3   :  { %v349_v16 = vmul.f32 %v1768_v58, %v348_v11  ;;  %vm372_vm12 = vmor %vm370_vm11, %vm371_vm10  ;;  %v375_v40 = vmul.f32 %v1774_v36, %v343_v19  ;;  %vm381_vm13 = vweird.f32 %v1774_v36 }
  0xd4   :  { %v359_v21 = vmul.f32 %v1770_v62, %v358_v15  ;;  %v366_v27 = vmul.f32 %v1772_v13, %v365_v18  ;;  %vm382_vm15 = vmor %vm380_vm14, %vm381_vm13 }
  0xd5   :  { %v353_v24 = vsel %vm352_vm7, %v1768_v58, %v349_v16  ;;  %v376_v48 = vmul.f32 %v1774_v36, %v375_v40 }
  0xd6   :  { %v384_v28 = vmul.f32 %v353_v24, %v336_v20  ;;  %v363_v30 = vsel %vm362_vm9, %v1770_v62, %v359_v21  ;;  %v367_v33 = vmul.f32 0.5, %v366_v27 }
  0xd7   :  { %v385_v31 = vmul.f32 %v363_v30, %v337_v25  ;;  %v377_v50 = vmul.f32 0.5, %v376_v48 }
  0xd8   :  { %v399_v34 = vmul.f32 %v391_v14, %v384_v28  ;;  %v368_v22 = vsub.f32 1.5, %v367_v33 }
  0xd9   :  { %v400_v42 = vmul.f32 %v392_v23, %v385_v31  ;;  %v378_v52 = vsub.f32 1.5, %v377_v50 }
  0xda   :  { %v2036_v35 = vadd.f32 %v406_v29, %v399_v34  ;;  %v369_v38 = vmul.f32 %v1772_v13, %v368_v22 }
  0xdb   :  { %v2038_v37 = vadd.f32 %v407_v32, %v400_v42  ;;  %v379_v54 = vmul.f32 %v1774_v36, %v378_v52 }
  0xdc   :  { %v418_v43 = vmax.f32 %v2036_v35, 0.0  ;;  %v373_v44 = vsel %vm372_vm12, %v1772_v13, %v369_v38 }
  0xdd   :  { %v419_v41 = vmax.f32 %v2038_v37, 0.0  ;;  %v386_v45 = vmul.f32 %v373_v44, %v338_v26  ;;  %v383_v55 = vsel %vm382_vm15, %v1774_v36, %v379_v54 }
  0xde   :  { %v387_v56 = vmul.f32 %v383_v55, %v339_v0 }
  0xdf   :  { %v401_v49 = vmul.f32 %v393_v39, %v386_v45 }
  0xe0   :  { %v402_v58 = vmul.f32 %v394_v47, %v387_v56 }
  0xe1   :  { %v2045_v51 = vadd.f32 %v408_v46, %v401_v49 }
  0xe2   :  { %v2051_v59 = vadd.f32 %v409_v57, %v402_v58 }
  0xe3   :  { %v420_v53 = vmax.f32 %v2045_v51, 0.0 }
  0xe4   :  { %v421_v61 = vmax.f32 %v2051_v59, 0.0 }
  0xe5   :  { %1901 = dma.done.wait [#allocation3], 12288 }
  0xe6   :  { %1902 = vsyncadd [#allocation3], 4294955008  ;;  %v1367_v62 = vld [vmem:[#allocation2 + $0xa8] sm:$0xf]  ;;  %v1688_v63 = vld [vmem:[#allocation2 + $0xb0] sm:$0xf0] }
  0xe7   :  { %v1463_v1 = vld [vmem:[#allocation2 + $0x168] sm:$0xf]  ;;  %v1368_v2 = vor.u32 %v1688_v63, %v1367_v62  ;;  %v1712_v3 = vld [vmem:[#allocation2 + $0x170] sm:$0xf0]  ;;  %v1355_v9 = vld [vmem:[#allocation2 + $0x90] sm:$0xf] }
  0xe8   :  { %v1559_v4 = vld [vmem:[#allocation2 + $0x228] sm:$0xf]  ;;  %v1736_v6 = vld [vmem:[#allocation2 + $0x230] sm:$0xf0]  ;;  %v1464_v60 = vor.u32 %v1712_v3, %v1463_v1  ;;  %v1685_v11 = vld [vmem:[#allocation2 + $0x98] sm:$0xf0] }
  0xe9   :  { %v1560_v5 = vor.u32 %v1736_v6, %v1559_v4  ;;  %v1655_v7 = vld [vmem:[#allocation2 + $0x2e8] sm:$0xf]  ;;  %v1760_v8 = vld [vmem:[#allocation2 + $0x2f0] sm:$0xf0]  ;;  %1078 = vmatpush.bf16.msra.mxu0 %v1368_v2  ;;  %v1451_v12 = vld [vmem:[#allocation2 + $0x150] sm:$0xf]  ;;  %v1356_v14 = vor.u32 %v1685_v11, %v1355_v9 }
  0xea   :  { %v1656_v10 = vor.u32 %v1760_v8, %v1655_v7  ;;  %v1709_v13 = vld [vmem:[#allocation2 + $0x158] sm:$0xf0]  ;;  %1091 = vmatpush.bf16.msra.mxu1 %v1464_v60  ;;  %v1547_v16 = vld [vmem:[#allocation2 + $0x210] sm:$0xf]  ;;  %v1343_v21 = vld [vmem:[#allocation2 + $0x78] sm:$0xf] }
  0xeb   :  { %1104 = vmatpush.bf16.msra.mxu2 %v1560_v5  ;;  %v1452_v15 = vor.u32 %v1709_v13, %v1451_v12  ;;  %v1733_v17 = vld [vmem:[#allocation2 + $0x218] sm:$0xf0]  ;;  %v1643_v18 = vld [vmem:[#allocation2 + $0x2d0] sm:$0xf]  ;;  %v1682_v23 = vld [vmem:[#allocation2 + $0x80] sm:$0xf0] }
  0xec   :  { %1117 = vmatpush.bf16.msra.mxu3 %v1656_v10  ;;  %v1548_v19 = vor.u32 %v1733_v17, %v1547_v16  ;;  %v1757_v20 = vld [vmem:[#allocation2 + $0x2d8] sm:$0xf0]  ;;  %v1439_v25 = vld [vmem:[#allocation2 + $0x138] sm:$0xf]  ;;  %v1706_v27 = vld [vmem:[#allocation2 + $0x140] sm:$0xf0]  ;;  %v1344_v29 = vor.u32 %v1682_v23, %v1343_v21 }
  0xed   :  { %v1644_v24 = vor.u32 %v1757_v20, %v1643_v18  ;;  %v1535_v28 = vld [vmem:[#allocation2 + $0x1f8] sm:$0xf]  ;;  %1079 = vmatpush.bf16.msra.mxu0 %v1356_v14  ;;  %v1730_v30 = vld [vmem:[#allocation2 + $0x200] sm:$0xf0]  ;;  %v1440_v33 = vor.u32 %v1706_v27, %v1439_v25  ;;  %v1331_v42 = vld [vmem:[#allocation2 + $0x60] sm:$0xf] }
  0xee   :  { %v1631_v31 = vld [vmem:[#allocation2 + $0x2b8] sm:$0xf]  ;;  %v1754_v32 = vld [vmem:[#allocation2 + $0x2c0] sm:$0xf0]  ;;  %1092 = vmatpush.bf16.msra.mxu1 %v1452_v15  ;;  %v1536_v34 = vor.u32 %v1730_v30, %v1535_v28  ;;  %v1679_v22 = vld [vmem:[#allocation2 + $0x68] sm:$0xf0] }
  0xef   :  { %1105 = vmatpush.bf16.msra.mxu2 %v1548_v19  ;;  %v1427_v36 = vld [vmem:[#allocation2 + $0x120] sm:$0xf]  ;;  %v1632_v38 = vor.u32 %v1754_v32, %v1631_v31  ;;  %v1703_v26 = vld [vmem:[#allocation2 + $0x128] sm:$0xf0]  ;;  %v1332_v46 = vor.u32 %v1679_v22, %v1331_v42  ;;  %v1319_v50 = vld [vmem:[#allocation2 + $0x48] sm:$0xf] }
  0xf0   :  { %1118 = vmatpush.bf16.msra.mxu3 %v1644_v24  ;;  %v1523_v39 = vld [vmem:[#allocation2 + $0x1e0] sm:$0xf]  ;;  %v1727_v40 = vld [vmem:[#allocation2 + $0x1e8] sm:$0xf0]  ;;  %v1428_v48 = vor.u32 %v1703_v26, %v1427_v36  ;;  %v1676_v52 = vld [vmem:[#allocation2 + $0x50] sm:$0xf0] }
  0xf1   :  { %v1619_v44 = vld [vmem:[#allocation2 + $0x2a0] sm:$0xf]  ;;  %v1751_v45 = vld [vmem:[#allocation2 + $0x2a8] sm:$0xf0]  ;;  %1080 = vmatpush.bf16.msra.mxu0 %v1344_v29  ;;  %v1524_v49 = vor.u32 %v1727_v40, %v1523_v39  ;;  %v1415_v54 = vld [vmem:[#allocation2 + $0x108] sm:$0xf]  ;;  %v1320_v62 = vor.u32 %v1676_v52, %v1319_v50 }
  0xf2   :  { %1093 = vmatpush.bf16.msra.mxu1 %v1440_v33  ;;  %v1620_v0 = vor.u32 %v1751_v45, %v1619_v44  ;;  %v1700_v47 = vld [vmem:[#allocation2 + $0x110] sm:$0xf0]  ;;  %v1511_v55 = vld [vmem:[#allocation2 + $0x1c8] sm:$0xf]  ;;  %v1307_v2 = vld [vmem:[#allocation2 + $0x30] sm:$0xf] }
  0xf3   :  { %1106 = vmatpush.bf16.msra.mxu2 %v1536_v34  ;;  %v1724_v56 = vld [vmem:[#allocation2 + $0x1d0] sm:$0xf0]  ;;  %v1607_v57 = vld [vmem:[#allocation2 + $0x288] sm:$0xf]  ;;  %v1416_v63 = vor.u32 %v1700_v47, %v1415_v54  ;;  %v1673_v3 = vld [vmem:[#allocation2 + $0x38] sm:$0xf0] }
  0xf4   :  { %1119 = vmatpush.bf16.msra.mxu3 %v1632_v38  ;;  %v1748_v58 = vld [vmem:[#allocation2 + $0x290] sm:$0xf0]  ;;  %v1512_v1 = vor.u32 %v1724_v56, %v1511_v55  ;;  %v1403_v4 = vld [vmem:[#allocation2 + $0xf0] sm:$0xf]  ;;  %v1697_v60 = vld [vmem:[#allocation2 + $0xf8] sm:$0xf0]  ;;  %v1308_v10 = vor.u32 %v1673_v3, %v1307_v2 }
  0xf5   :  { %1081 = vmatpush.bf16.msra.mxu0 %v1332_v46  ;;  %v1608_v6 = vor.u32 %v1748_v58, %v1607_v57  ;;  %v1499_v5 = vld [vmem:[#allocation2 + $0x1b0] sm:$0xf]  ;;  %v1721_v7 = vld [vmem:[#allocation2 + $0x1b8] sm:$0xf0]  ;;  %v1404_v11 = vor.u32 %v1697_v60, %v1403_v4  ;;  %v1295_v13 = vld [vmem:[#allocation2 + $0x18] sm:$0xf]  ;;  %v2062_v4 = vpack.c.bf16 %v418_v43, %v418_v43 }
  0xf6   :  { %1094 = vmatpush.bf16.msra.mxu1 %v1428_v48  ;;  %v1595_v8 = vld [vmem:[#allocation2 + $0x270] sm:$0xf]  ;;  %v1745_v9 = vld [vmem:[#allocation2 + $0x278] sm:$0xf0]  ;;  %v1500_v12 = vor.u32 %v1721_v7, %v1499_v5  ;;  %v1670_v14 = vld [vmem:[#allocation2 + $0x20] sm:$0xf0] }
  0xf7   :  { %1107 = vmatpush.bf16.msra.mxu2 %v1524_v49  ;;  %v1391_v15 = vld [vmem:[#allocation2 + $0xd8] sm:$0xf]  ;;  %v1596_v16 = vor.u32 %v1745_v9, %v1595_v8  ;;  %v1694_v17 = vld [vmem:[#allocation2 + $0xe0] sm:$0xf0]  ;;  %v1296_v23 = vor.u32 %v1670_v14, %v1295_v13  ;;  %v1283_v24 = vld [vmem:[#allocation2] sm:$0xf] }
  0xf8   :  { %1120 = vmatpush.bf16.msra.mxu3 %v1620_v0  ;;  %v1487_v18 = vld [vmem:[#allocation2 + $0x198] sm:$0xf]  ;;  %v1718_v19 = vld [vmem:[#allocation2 + $0x1a0] sm:$0xf0]  ;;  %v1667_v25 = vld [vmem:[#allocation2 + $0x8] sm:$0xf0]  ;;  %v1392_v27 = vor.u32 %v1694_v17, %v1391_v15 }
  0xf9   :  { %1082 = vmatpush.bf16.msra.mxu0 %v1320_v62  ;;  %v1583_v20 = vld [vmem:[#allocation2 + $0x258] sm:$0xf]  ;;  %v1742_v21 = vld [vmem:[#allocation2 + $0x260] sm:$0xf0]  ;;  %v1488_v28 = vor.u32 %v1718_v19, %v1487_v18  ;;  %v1379_v29 = vld [vmem:[#allocation2 + $0xc0] sm:$0xf]  ;;  %v1284_v26 = vor.u32 %v1667_v25, %v1283_v24 }
  0xfa   :  { %1095 = vmatpush.bf16.msra.mxu1 %v1416_v63  ;;  %v1691_v30 = vld [vmem:[#allocation2 + $0xc8] sm:$0xf0]  ;;  %v1475_v31 = vld [vmem:[#allocation2 + $0x180] sm:$0xf]  ;;  %v1584_v32 = vor.u32 %v1742_v21, %v1583_v20  ;;  %v1369_v36 = vld [vmem:[#allocation2 + $0xb4] sm:$0xf0] }
  0xfb   :  { %1108 = vmatpush.bf16.msra.mxu2 %v1512_v1  ;;  %v1715_v33 = vld [vmem:[#allocation2 + $0x188] sm:$0xf0]  ;;  %v1571_v34 = vld [vmem:[#allocation2 + $0x240] sm:$0xf]  ;;  %v1465_v39 = vld [vmem:[#allocation2 + $0x174] sm:$0xf0]  ;;  %v1380_v45 = vor.u32 %v1691_v30, %v1379_v29  ;;  %v2057_v1 = vpack.c.bf16 %v420_v53, %v420_v53  ;;  %v2072_v53 = vpack.c.bf16 %v419_v41, %v419_v41 }
  0xfc   :  { %1121 = vmatpush.bf16.msra.mxu3 %v1608_v6  ;;  %v1739_v42 = vld [vmem:[#allocation2 + $0x248] sm:$0xf0]  ;;  %v1561_v44 = vld [vmem:[#allocation2 + $0x234] sm:$0xf0]  ;;  %v1476_v46 = vor.u32 %v1715_v33, %v1475_v31  ;;  %v1684_v47 = vld [vmem:[#allocation2 + $0x94] sm:$0xf]  ;;  %v2067_v6 = vpack.c.bf16 %v421_v61, %v421_v61 }
  0xfd   :  { %1083 = vmatpush.bf16.msra.mxu0 %v1308_v10  ;;  %v1687_v22 = vld [vmem:[#allocation2 + $0xac] sm:$0xf]  ;;  %v1657_v49 = vld [vmem:[#allocation2 + $0x2f4] sm:$0xf0]  ;;  %v1572_v50 = vor.u32 %v1739_v42, %v1571_v34  ;;  %v1357_v55 = vld [vmem:[#allocation2 + $0x9c] sm:$0xf0] }
  0xfe   :  { %1096 = vmatpush.bf16.msra.mxu1 %v1404_v11  ;;  %v1711_v38 = vld [vmem:[#allocation2 + $0x16c] sm:$0xf]  ;;  %v1372_v52 = vor.u32 %v1687_v22, %v1369_v36  ;;  %v1708_v56 = vld [vmem:[#allocation2 + $0x154] sm:$0xf]  ;;  %v1453_v58 = vld [vmem:[#allocation2 + $0x15c] sm:$0xf0]  ;;  %v1360_v51 = vor.u32 %v1684_v47, %v1357_v55 }
  0xff   :  { %1109 = vmatpush.bf16.msra.mxu2 %v1500_v12  ;;  %v1735_v40 = vld [vmem:[#allocation2 + $0x22c] sm:$0xf]  ;;  %v1468_v54 = vor.u32 %v1711_v38, %v1465_v39  ;;  %v1732_v62 = vld [vmem:[#allocation2 + $0x214] sm:$0xf]  ;;  %v1549_v63 = vld [vmem:[#allocation2 + $0x21c] sm:$0xf0]  ;;  %v1456_v60 = vor.u32 %v1708_v56, %v1453_v58 }
 0x100   :  { %1122 = vmatpush.bf16.msra.mxu3 %v1596_v16  ;;  %v1759_v48 = vld [vmem:[#allocation2 + $0x2ec] sm:$0xf]  ;;  %v1564_v0 = vor.u32 %v1735_v40, %v1561_v44  ;;  %v1756_v2 = vld [vmem:[#allocation2 + $0x2d4] sm:$0xf]  ;;  %v1645_v3 = vld [vmem:[#allocation2 + $0x2dc] sm:$0xf0]  ;;  %v1552_v35 = vor.u32 %v1732_v62, %v1549_v63 }
 0x101   :  { %1084 = vmatpush.bf16.msra.mxu0 %v1296_v23  ;;  %v1660_v57 = vor.u32 %v1759_v48, %v1657_v49  ;;  %v1681_v5 = vld [vmem:[#allocation2 + $0x7c] sm:$0xf]  ;;  %v1345_v43 = vld [vmem:[#allocation2 + $0x84] sm:$0xf0]  ;;  %v1648_v59 = vor.u32 %v1756_v2, %v1645_v3  ;;  %v1678_v13 = vld [vmem:[#allocation2 + $0x64] sm:$0xf] }
 0x102   :  { %1097 = vmatpush.bf16.msra.mxu1 %v1392_v27  ;;  %v1705_v7 = vld [vmem:[#allocation2 + $0x13c] sm:$0xf]  ;;  %v1441_v8 = vld [vmem:[#allocation2 + $0x144] sm:$0xf0]  ;;  %v1348_v37 = vor.u32 %v1681_v5, %v1345_v43  ;;  %v1333_v14 = vld [vmem:[#allocation2 + $0x6c] sm:$0xf0] }
 0x103   :  { %1110 = vmatpush.bf16.msra.mxu2 %v1488_v28  ;;  %v1729_v61 = vld [vmem:[#allocation2 + $0x1fc] sm:$0xf]  ;;  %v1537_v9 = vld [vmem:[#allocation2 + $0x204] sm:$0xf0]  ;;  %v1444_v41 = vor.u32 %v1705_v7, %v1441_v8  ;;  %v1702_v15 = vld [vmem:[#allocation2 + $0x124] sm:$0xf]  ;;  %v1336_v23 = vor.u32 %v1678_v13, %v1333_v14 }
 0x104   :  { %1123 = vmatpush.bf16.msra.mxu3 %v1584_v32  ;;  %v1753_v10 = vld [vmem:[#allocation2 + $0x2bc] sm:$0xf]  ;;  %v1633_v11 = vld [vmem:[#allocation2 + $0x2c4] sm:$0xf0]  ;;  %v1540_v12 = vor.u32 %v1729_v61, %v1537_v9  ;;  %v1429_v17 = vld [vmem:[#allocation2 + $0x12c] sm:$0xf0] }
 0x105   :  { %1085 = vmatpush.bf16.msra.mxu0 %v1284_v26  ;;  %v1636_v16 = vor.u32 %v1753_v10, %v1633_v11  ;;  %v1726_v18 = vld [vmem:[#allocation2 + $0x1e4] sm:$0xf]  ;;  %v1525_v19 = vld [vmem:[#allocation2 + $0x1ec] sm:$0xf0]  ;;  %v1432_v24 = vor.u32 %v1702_v15, %v1429_v17  ;;  %v1675_v27 = vld [vmem:[#allocation2 + $0x4c] sm:$0xf] }
 0x106   :  { %1098 = vmatpush.bf16.msra.mxu1 %v1380_v45  ;;  %v1750_v20 = vld [vmem:[#allocation2 + $0x2a4] sm:$0xf]  ;;  %v1621_v21 = vld [vmem:[#allocation2 + $0x2ac] sm:$0xf0]  ;;  %v1528_v25 = vor.u32 %v1726_v18, %v1525_v19  ;;  %v1321_v28 = vld [vmem:[#allocation2 + $0x54] sm:$0xf0] }
 0x107   :  { %1111 = vmatpush.bf16.msra.mxu2 %v1476_v46  ;;  %v1699_v29 = vld [vmem:[#allocation2 + $0x10c] sm:$0xf]  ;;  %v1624_v30 = vor.u32 %v1750_v20, %v1621_v21  ;;  %v1417_v31 = vld [vmem:[#allocation2 + $0x114] sm:$0xf0]  ;;  %v1324_v22 = vor.u32 %v1675_v27, %v1321_v28  ;;  %v1672_v26 = vld [vmem:[#allocation2 + $0x34] sm:$0xf] }
 0x108   :  { %1124 = vmatpush.bf16.msra.mxu3 %v1572_v50  ;;  %1086 = vmatmul.bf16.vlgmr.msra.gmra.mxu0 %v2062_v4  ;;  %v1723_v32 = vld [vmem:[#allocation2 + $0x1cc] sm:$0xf]  ;;  %v1513_v33 = vld [vmem:[#allocation2 + $0x1d4] sm:$0xf0]  ;;  %v1420_v36 = vor.u32 %v1699_v29, %v1417_v31  ;;  %v1309_v39 = vld [vmem:[#allocation2 + $0x3c] sm:$0xf0] }
 0x109   :  { %1130 = vmatpush.bf16.msrb.mxu0 %v1372_v52  ;;  %1099 = vmatmul.bf16.vlgmr.msra.gmra.mxu1 %v2072_v53  ;;  %v1747_v34 = vld [vmem:[#allocation2 + $0x28c] sm:$0xf]  ;;  %v1609_v42 = vld [vmem:[#allocation2 + $0x294] sm:$0xf0]  ;;  %v1516_v38 = vor.u32 %v1723_v32, %v1513_v33  ;;  %v1696_v40 = vld [vmem:[#allocation2 + $0xf4] sm:$0xf]  ;;  %v1312_v52 = vor.u32 %v1672_v26, %v1309_v39 }
 0x10a   :  { %1143 = vmatpush.bf16.msrb.mxu1 %v1468_v54  ;;  %1112 = vmatmul.bf16.vlgmr.msra.gmra.mxu2 %v2057_v1  ;;  %v1612_v44 = vor.u32 %v1747_v34, %v1609_v42  ;;  %v1405_v45 = vld [vmem:[#allocation2 + $0xfc] sm:$0xf0]  ;;  %v1720_v46 = vld [vmem:[#allocation2 + $0x1b4] sm:$0xf]  ;;  %v1669_v47 = vld [vmem:[#allocation2 + $0x1c] sm:$0xf] }
 0x10b   :  { %1156 = vmatpush.bf16.msrb.mxu2 %v1564_v0  ;;  %1125 = vmatmul.bf16.vlgmr.msra.gmra.mxu3 %v2067_v6  ;;  %v1501_v48 = vld [vmem:[#allocation2 + $0x1bc] sm:$0xf0]  ;;  %v1744_v49 = vld [vmem:[#allocation2 + $0x274] sm:$0xf]  ;;  %v1408_v54 = vor.u32 %v1696_v40, %v1405_v45  ;;  %v1297_v55 = vld [vmem:[#allocation2 + $0x24] sm:$0xf0] }
 0x10c   :  { %1169 = vmatpush.bf16.msrb.mxu3 %v1660_v57  ;;  %v1597_v50 = vld [vmem:[#allocation2 + $0x27c] sm:$0xf0]  ;;  %v1504_v0 = vor.u32 %v1720_v46, %v1501_v48  ;;  %v1693_v56 = vld [vmem:[#allocation2 + $0xdc] sm:$0xf]  ;;  %v1393_v58 = vld [vmem:[#allocation2 + $0xe4] sm:$0xf0] }
 0x10d   :  { %1131 = vmatpush.bf16.msrb.mxu0 %v1360_v51  ;;  %v1600_v57 = vor.u32 %v1744_v49, %v1597_v50  ;;  %v1717_v62 = vld [vmem:[#allocation2 + $0x19c] sm:$0xf]  ;;  %v1489_v63 = vld [vmem:[#allocation2 + $0x1a4] sm:$0xf0]  ;;  %v1300_v51 = vor.u32 %v1669_v47, %v1297_v55  ;;  %v1396_v5 = vor.u32 %v1693_v56, %v1393_v58  ;;  %v1690_v7 = vld [vmem:[#allocation2 + $0xc4] sm:$0xf] }
 0x10e   :  { %1144 = vmatpush.bf16.msrb.mxu1 %v1456_v60  ;;  %v1741_v2 = vld [vmem:[#allocation2 + $0x25c] sm:$0xf]  ;;  %v1585_v3 = vld [vmem:[#allocation2 + $0x264] sm:$0xf0]  ;;  %v1666_v60 = vld [vmem:[#allocation2 + $0x4] sm:$0xf]  ;;  %v1492_v43 = vor.u32 %v1717_v62, %v1489_v63 }
 0x10f   :  { %1157 = vmatpush.bf16.msrb.mxu2 %v1552_v35  ;;  %v1285_v35 = vld [vmem:[#allocation2 + $0xc] sm:$0xf0]  ;;  %v1714_v8 = vld [vmem:[#allocation2 + $0x184] sm:$0xf]  ;;  %v1588_v61 = vor.u32 %v1741_v2, %v1585_v3  ;;  %v1713_v14 = vld [vmem:[#allocation2 + $0x178] sm:$0xf0] }
 0x110   :  { %1170 = vmatpush.bf16.msrb.mxu3 %v1648_v59  ;;  %v1381_v59 = vld [vmem:[#allocation2 + $0xcc] sm:$0xf0]  ;;  %v1738_v10 = vld [vmem:[#allocation2 + $0x244] sm:$0xf]  ;;  %v1288_v13 = vor.u32 %v1666_v60, %v1285_v35  ;;  %v1761_v20 = vld [vmem:[#allocation2 + $0x2f8] sm:$0xf0] }
 0x111   :  { %1132 = vmatpush.bf16.msrb.mxu0 %v1348_v37  ;;  %v1477_v9 = vld [vmem:[#allocation2 + $0x18c] sm:$0xf0]  ;;  %v1384_v17 = vor.u32 %v1690_v7, %v1381_v59  ;;  %v1363_v27 = vld [vmem:[#allocation2 + $0x98] sm:$0xf]  ;;  %v1686_v28 = vld [vmem:[#allocation2 + $0xa0] sm:$0xf0] }
 0x112   :  { %1145 = vmatpush.bf16.msrb.mxu1 %v1444_v41  ;;  %v1573_v11 = vld [vmem:[#allocation2 + $0x24c] sm:$0xf0]  ;;  %v1689_v41 = vld [vmem:[#allocation2 + $0xb8] sm:$0xf0]  ;;  %v1480_v18 = vor.u32 %v1714_v8, %v1477_v9  ;;  %v1459_v29 = vld [vmem:[#allocation2 + $0x158] sm:$0xf] }
 0x113   :  { %1158 = vmatpush.bf16.msrb.mxu2 %v1540_v12  ;;  %v1375_v37 = vld [vmem:[#allocation2 + $0xb0] sm:$0xf]  ;;  %v1576_v21 = vor.u32 %v1738_v10, %v1573_v11  ;;  %v1710_v31 = vld [vmem:[#allocation2 + $0x160] sm:$0xf0]  ;;  %v1555_v32 = vld [vmem:[#allocation2 + $0x218] sm:$0xf] }
 0x114   :  { %1171 = vmatpush.bf16.msrb.mxu3 %v1636_v16  ;;  %v1471_v12 = vld [vmem:[#allocation2 + $0x170] sm:$0xf]  ;;  %v1737_v16 = vld [vmem:[#allocation2 + $0x238] sm:$0xf0]  ;;  %v1734_v33 = vld [vmem:[#allocation2 + $0x220] sm:$0xf0] }
 0x115   :  { %1133 = vmatpush.bf16.msrb.mxu0 %v1336_v23  ;;  %v1567_v15 = vld [vmem:[#allocation2 + $0x230] sm:$0xf]  ;;  %v1376_v23 = vor.u32 %v1689_v41, %v1375_v37  ;;  %v1651_v34 = vld [vmem:[#allocation2 + $0x2d8] sm:$0xf]  ;;  %v1758_v42 = vld [vmem:[#allocation2 + $0x2e0] sm:$0xf0] }
 0x116   :  { %1146 = vmatpush.bf16.msrb.mxu1 %v1432_v24  ;;  %v1663_v19 = vld [vmem:[#allocation2 + $0x2f0] sm:$0xf]  ;;  %v1472_v24 = vor.u32 %v1713_v14, %v1471_v12  ;;  %v1351_v26 = vld [vmem:[#allocation2 + $0x80] sm:$0xf]  ;;  %v1683_v39 = vld [vmem:[#allocation2 + $0x88] sm:$0xf0] }
 0x117   :  { %1159 = vmatpush.bf16.msrb.mxu2 %v1528_v25  ;;  %v1568_v25 = vor.u32 %v1737_v16, %v1567_v15  ;;  %v1447_v40 = vld [vmem:[#allocation2 + $0x140] sm:$0xf]  ;;  %v1707_v45 = vld [vmem:[#allocation2 + $0x148] sm:$0xf0]  ;;  %v1339_v47 = vld [vmem:[#allocation2 + $0x68] sm:$0xf] }
 0x118   :  { %1172 = vmatpush.bf16.msrb.mxu3 %v1624_v30  ;;  %v1664_v30 = vor.u32 %v1761_v20, %v1663_v19  ;;  %v1543_v46 = vld [vmem:[#allocation2 + $0x200] sm:$0xf]  ;;  %v1731_v48 = vld [vmem:[#allocation2 + $0x208] sm:$0xf0]  ;;  %v1680_v55 = vld [vmem:[#allocation2 + $0x70] sm:$0xf0] }
 0x119   :  { %1134 = vmatpush.bf16.msrb.mxu0 %v1324_v22  ;;  %v1364_v22 = vor.u32 %v1686_v28, %v1363_v27  ;;  %v1639_v49 = vld [vmem:[#allocation2 + $0x2c0] sm:$0xf]  ;;  %v1755_v50 = vld [vmem:[#allocation2 + $0x2c8] sm:$0xf0]  ;;  %v1435_v56 = vld [vmem:[#allocation2 + $0x128] sm:$0xf] }
 0x11a   :  { %1147 = vmatpush.bf16.msrb.mxu1 %v1420_v36  ;;  %v1460_v36 = vor.u32 %v1710_v31, %v1459_v29  ;;  %v1704_v58 = vld [vmem:[#allocation2 + $0x130] sm:$0xf0]  ;;  %v1531_v62 = vld [vmem:[#allocation2 + $0x1e8] sm:$0xf]  ;;  %v1423_v7 = vld [vmem:[#allocation2 + $0x110] sm:$0xf] }
 0x11b   :  { %1160 = vmatpush.bf16.msrb.mxu2 %v1516_v38  ;;  %v1556_v38 = vor.u32 %v1734_v33, %v1555_v32  ;;  %v1728_v63 = vld [vmem:[#allocation2 + $0x1f0] sm:$0xf0]  ;;  %v1627_v2 = vld [vmem:[#allocation2 + $0x2a8] sm:$0xf]  ;;  %v1436_v60 = vor.u32 %v1704_v58, %v1435_v56  ;;  %v1701_v8 = vld [vmem:[#allocation2 + $0x118] sm:$0xf0] }
 0x11c   :  { %1173 = vmatpush.bf16.msrb.mxu3 %v1612_v44  ;;  %v1652_v44 = vor.u32 %v1758_v42, %v1651_v34  ;;  %v1752_v3 = vld [vmem:[#allocation2 + $0x2b0] sm:$0xf0]  ;;  %v1532_v35 = vor.u32 %v1728_v63, %v1531_v62  ;;  %v1725_v9 = vld [vmem:[#allocation2 + $0x1d8] sm:$0xf0]  ;;  %v1615_v10 = vld [vmem:[#allocation2 + $0x290] sm:$0xf]  ;;  %v1424_v41 = vor.u32 %v1701_v8, %v1423_v7 }
 0x11d   :  { %1135 = vmatpush.bf16.msrb.mxu0 %v1312_v52  ;;  %v1352_v52 = vor.u32 %v1683_v39, %v1351_v26  ;;  %v1628_v59 = vor.u32 %v1752_v3, %v1627_v2  ;;  %v1749_v11 = vld [vmem:[#allocation2 + $0x298] sm:$0xf0]  ;;  %v1674_v14 = vld [vmem:[#allocation2 + $0x40] sm:$0xf0]  ;;  %v1411_v15 = vld [vmem:[#allocation2 + $0xf8] sm:$0xf] }
 0x11e   :  { %1148 = vmatpush.bf16.msrb.mxu1 %v1408_v54  ;;  %v1448_v54 = vor.u32 %v1707_v45, %v1447_v40  ;;  %v1616_v16 = vor.u32 %v1749_v11, %v1615_v10  ;;  %v1722_v19 = vld [vmem:[#allocation2 + $0x1c0] sm:$0xf0]  ;;  %v1603_v20 = vld [vmem:[#allocation2 + $0x278] sm:$0xf]  ;;  %v1303_v27 = vld [vmem:[#allocation2 + $0x20] sm:$0xf] }
 0x11f   :  { %1161 = vmatpush.bf16.msrb.mxu2 %v1504_v0  ;;  %v1544_v0 = vor.u32 %v1731_v48, %v1543_v46  ;;  %v1671_v28 = vld [vmem:[#allocation2 + $0x28] sm:$0xf0]  ;;  %v1399_v29 = vld [vmem:[#allocation2 + $0xe0] sm:$0xf]  ;;  %v1291_v26 = vld [vmem:[#allocation2 + $0x8] sm:$0xf] }
 0x120   :  { %1174 = vmatpush.bf16.msrb.mxu3 %v1600_v57  ;;  %v1640_v57 = vor.u32 %v1755_v50, %v1639_v49  ;;  %v1695_v31 = vld [vmem:[#allocation2 + $0xe8] sm:$0xf0]  ;;  %v1495_v32 = vld [vmem:[#allocation2 + $0x1a0] sm:$0xf]  ;;  %v1668_v39 = vld [vmem:[#allocation2 + $0x10] sm:$0xf0] }
 0x121   :  { %1136 = vmatpush.bf16.msrb.mxu0 %v1300_v51  ;;  %v1340_v51 = vor.u32 %v1680_v55, %v1339_v47  ;;  %v1719_v33 = vld [vmem:[#allocation2 + $0x1a8] sm:$0xf0]  ;;  %v1591_v34 = vld [vmem:[#allocation2 + $0x260] sm:$0xf]  ;;  %v1387_v40 = vld [vmem:[#allocation2 + $0xc8] sm:$0xf] }
 0x122   :  { %1149 = vmatpush.bf16.msrb.mxu1 %v1396_v5  ;;  %v1327_v5 = vld [vmem:[#allocation2 + $0x50] sm:$0xf]  ;;  %v1743_v42 = vld [vmem:[#allocation2 + $0x268] sm:$0xf0]  ;;  %v1692_v45 = vld [vmem:[#allocation2 + $0xd0] sm:$0xf0] }
 0x123   :  { %1162 = vmatpush.bf16.msrb.mxu2 %v1492_v43  ;;  %v1677_v43 = vld [vmem:[#allocation2 + $0x58] sm:$0xf0]  ;;  %v1483_v46 = vld [vmem:[#allocation2 + $0x188] sm:$0xf]  ;;  %v1716_v48 = vld [vmem:[#allocation2 + $0x190] sm:$0xf0] }
 0x124   :  { %1175 = vmatpush.bf16.msrb.mxu3 %v1588_v61  ;;  %v1519_v61 = vld [vmem:[#allocation2 + $0x1d0] sm:$0xf]  ;;  %v1328_v37 = vor.u32 %v1677_v43, %v1327_v5  ;;  %v1579_v49 = vld [vmem:[#allocation2 + $0x248] sm:$0xf]  ;;  %v1740_v50 = vld [vmem:[#allocation2 + $0x250] sm:$0xf0] }
 0x125   :  { %1137 = vmatpush.bf16.msrb.mxu0 %v1288_v13  ;;  %v1520_v12 = vor.u32 %v1725_v9, %v1519_v61  ;;  %v1315_v13 = vld [vmem:[#allocation2 + $0x38] sm:$0xf]  ;;  %v1580_v47 = vor.u32 %v1740_v50, %v1579_v49  ;;  %v558_v7 = vld [vmem:[#allocation10] ss:$2 sm:$0x7]  ;;  %vm1256_vm0 = vcmask 7168  }
 0x126   :  { %1150 = vmatpush.bf16.msrb.mxu1 %v1384_v17  ;;  %v1698_v17 = vld [vmem:[#allocation2 + $0x100] sm:$0xf0]  ;;  %v560_v8 = vperm.slane %v558_v7, 0  ;;  %v562_v11 = vperm.slane %v558_v7, 2 }
 0x127   :  { %1163 = vmatpush.bf16.msrb.mxu2 %v1480_v18  ;;  %v1507_v18 = vld [vmem:[#allocation2 + $0x1b8] sm:$0xf] }
 0x128   :  { %1176 = vmatpush.bf16.msrb.mxu3 %v1576_v21  ;;  %1138 = vmatmul.bf16.vlgmr.msrb.gmra.mxu0 %v2062_v4  ;;  %v1746_v21 = vld [vmem:[#allocation2 + $0x280] sm:$0xf0] }
 0x129   :  { %1182 = vmatpush.bf16.msra.mxu0 %v1376_v23  ;;  %1151 = vmatmul.bf16.vlgmr.msrb.gmra.mxu1 %v2072_v53  ;;  %v1316_v23 = vor.u32 %v1674_v14, %v1315_v13 }
 0x12a   :  { %1195 = vmatpush.bf16.msra.mxu1 %v1472_v24  ;;  %1164 = vmatmul.bf16.vlgmr.msrb.gmra.mxu2 %v2057_v1  ;;  %v1412_v24 = vor.u32 %v1698_v17, %v1411_v15 }
 0x12b   :  { %1208 = vmatpush.bf16.msra.mxu2 %v1568_v25  ;;  %1177 = vmatmul.bf16.vlgmr.msrb.gmra.mxu3 %v2067_v6  ;;  %v1508_v25 = vor.u32 %v1722_v19, %v1507_v18  ;;  %v1238_v18 = vld [vmem:[#allocation10 + $0x1] ss:$2 sm:$0x7] }
 0x12c   :  { %1221 = vmatpush.bf16.msra.mxu3 %v1664_v30  ;;  %v1604_v30 = vor.u32 %v1746_v21, %v1603_v20  ;;  %v1241_v20 = vperm.slane %v1238_v18, 1 }
 0x12d   :  { %1183 = vmatpush.bf16.msra.mxu0 %v1364_v22  ;;  %v1304_v22 = vor.u32 %v1671_v28, %v1303_v27 }
 0x12e   :  { %1196 = vmatpush.bf16.msra.mxu1 %v1460_v36  ;;  %v1400_v36 = vor.u32 %v1695_v31, %v1399_v29 }
 0x12f   :  { %1209 = vmatpush.bf16.msra.mxu2 %v1556_v38  ;;  %v1496_v38 = vor.u32 %v1719_v33, %v1495_v32  ;;  %v1242_v32 = vperm.slane %v1238_v18, 2 }
 0x130   :  { %1222 = vmatpush.bf16.msra.mxu3 %v1652_v44  ;;  %v1592_v44 = vor.u32 %v1743_v42, %v1591_v34 }
 0x131   :  { %1184 = vmatpush.bf16.msra.mxu0 %v1352_v52  ;;  %v1292_v52 = vor.u32 %v1668_v39, %v1291_v26  ;;  %v1254_v39 = vstv %s2099_s7 }
 0x132   :  { %1197 = vmatpush.bf16.msra.mxu1 %v1448_v54  ;;  %v1388_v54 = vor.u32 %v1692_v45, %v1387_v40 }
 0x133   :  { %1210 = vmatpush.bf16.msra.mxu2 %v1544_v0  ;;  %v1484_v0 = vor.u32 %v1716_v48, %v1483_v46 }
 0x134   :  { %1223 = vmatpush.bf16.msra.mxu3 %v1640_v57 }
 0x135   :  { %1185 = vmatpush.bf16.msra.mxu0 %v1340_v51 }
 0x136   :  { %1198 = vmatpush.bf16.msra.mxu1 %v1436_v60 }
 0x137   :  { %1211 = vmatpush.bf16.msra.mxu2 %v1532_v35 }
 0x138   :  { %1224 = vmatpush.bf16.msra.mxu3 %v1628_v59  ;;  %v561_v59 = vperm.slane %v558_v7, 1 }
 0x139   :  { %1186 = vmatpush.bf16.msra.mxu0 %v1328_v37 }
 0x13a   :  { %1199 = vmatpush.bf16.msra.mxu1 %v1424_v41 }
 0x13b   :  { %1212 = vmatpush.bf16.msra.mxu2 %v1520_v12 }
 0x13c   :  { %1225 = vmatpush.bf16.msra.mxu3 %v1616_v16 }
 0x13d   :  { %1187 = vmatpush.bf16.msra.mxu0 %v1316_v23 }
 0x13e   :  { %1200 = vmatpush.bf16.msra.mxu1 %v1412_v24  ;;  %v1240_v24 = vperm.slane %v1238_v18, 0 }
 0x13f   :  { %1213 = vmatpush.bf16.msra.mxu2 %v1508_v25 }
 0x140   :  { %1226 = vmatpush.bf16.msra.mxu3 %v1604_v30 }
 0x141   :  { %1188 = vmatpush.bf16.msra.mxu0 %v1304_v22 }
 0x142   :  { %1201 = vmatpush.bf16.msra.mxu1 %v1400_v36 }
 0x143   :  { %1214 = vmatpush.bf16.msra.mxu2 %v1496_v38 }
 0x144   :  { %1227 = vmatpush.bf16.msra.mxu3 %v1592_v44 }
 0x145   :  { %1189 = vmatpush.bf16.msra.mxu0 %v1292_v52 }
 0x146   :  { %1202 = vmatpush.bf16.msra.mxu1 %v1388_v54 }
 0x147   :  { %1215 = vmatpush.bf16.msra.mxu2 %v1484_v0 }
 0x148   :  { %1228 = vmatpush.bf16.msra.mxu3 %v1580_v47  ;;  %1190 = vmatmul.bf16.vlgmr.msra.gmra.mxu0 %v2062_v4 }
 0x149   :  { %1203 = vmatmul.bf16.vlgmr.msra.gmra.mxu1 %v2072_v53 }
 0x14a   :  { %1216 = vmatmul.bf16.vlgmr.msra.gmra.mxu2 %v2057_v1 }
 0x14b   :  { %1229 = vmatmul.bf16.vlgmr.msra.gmra.mxu3 %v2067_v6 }
 0x185   :  { %v1087_v55 = vpop.f32.mrf.mxu0 }
 0x186   :  { %v1100_v56 = vpop.f32.mrf.mxu1  ;;  %v1088_v61 = vadd.f32 %v1087_v55, %v560_v8 }
 0x188   :  { %v1101_v10 = vadd.f32 %v1100_v56, %v1088_v61 }
 0x18d   :  { %v1113_v57 = vpop.f32.mrf.mxu2  ;;  %v1089_v62 = vpop.f32.mrf.mxu0 }
 0x18e   :  { %v1126_v58 = vpop.f32.mrf.mxu3  ;;  %v1102_v63 = vpop.f32.mrf.mxu1  ;;  %v1114_v41 = vadd.f32 %v1113_v57, %v1101_v10 }
 0x190   :  { %v1127_v16 = vadd.f32 %v1126_v58, %v1114_v41 }
 0x192   :  { %v1234_v23 = vmax.f32 %v1127_v16, 0.0 }
 0x194   :  { %v1246_v33 = vmul.f32 %v1240_v24, %v1234_v23 }
 0x195   :  { %v1115_v2 = vpop.f32.mrf.mxu2 }
 0x196   :  { %v1128_v3 = vpop.f32.mrf.mxu3 }
 0x1a5   :  { %v1139_v51 = vpop.f32.mrf.mxu0 }
 0x1a6   :  { %v1152_v60 = vpop.f32.mrf.mxu1  ;;  %v1140_v6 = vadd.f32 %v1139_v51, %v561_v59 }
 0x1a8   :  { %v1153_v9 = vadd.f32 %v1152_v60, %v1140_v6 }
 0x1ad   :  { %v1165_v35 = vpop.f32.mrf.mxu2  ;;  %v1141_v43 = vpop.f32.mrf.mxu0 }
 0x1ae   :  { %v1178_v5 = vpop.f32.mrf.mxu3  ;;  %v1154_v4 = vpop.f32.mrf.mxu1  ;;  %v1166_v37 = vadd.f32 %v1165_v35, %v1153_v9 }
 0x1b0   :  { %v1179_v15 = vadd.f32 %v1178_v5, %v1166_v37 }
 0x1b2   :  { %v1235_v19 = vmax.f32 %v1179_v15, 0.0 }
 0x1b4   :  { %v1247_v30 = vmul.f32 %v1241_v20, %v1235_v19 }
 0x1b5   :  { %v1167_v53 = vpop.f32.mrf.mxu2 }
 0x1b6   :  { %v1180_v1 = vpop.f32.mrf.mxu3  ;;  %v1249_v22 = vadd.f32 %v1247_v30, %v1246_v33 }
 0x1c5   :  { %v1191_v12 = vpop.f32.mrf.mxu0 }
 0x1c6   :  { %v1192_v13 = vadd.f32 %v1191_v12, %v562_v11  ;;  %v1204_v14 = vpop.f32.mrf.mxu1 }
 0x1c8   :  { %v1205_v17 = vadd.f32 %v1204_v14, %v1192_v13 }
 0x1cd   :  { %v1217_v21 = vpop.f32.mrf.mxu2  ;;  %v1193_v28 = vpop.f32.mrf.mxu0 }
 0x1ce   :  { %v1218_v25 = vadd.f32 %v1217_v21, %v1205_v17  ;;  %v1230_v27 = vpop.f32.mrf.mxu3  ;;  %v1206_v29 = vpop.f32.mrf.mxu1 }
 0x1d0   :  { %v1231_v31 = vadd.f32 %v1230_v27, %v1218_v25 }
 0x1d2   :  { %v1236_v34 = vmax.f32 %v1231_v31, 0.0 }
 0x1d4   :  { %v1248_v42 = vmul.f32 %v1242_v32, %v1236_v34 }
 0x1d5   :  { %v1219_v36 = vpop.f32.mrf.mxu2 }
 0x1d6   :  { %v1232_v38 = vpop.f32.mrf.mxu3  ;;  %v1250_v26 = vadd.f32 %v1249_v22, %v1248_v42 }
 0x1d8   :  { %1251 = vadd.xlane.f32.xlu0 %v1250_v26 }
 0x24b   :  { %v1252_v40 = vpop.xlane.xlu0 %1251 }
 0x24c   :  { %v1255_v44 = vadd.f32 %v1254_v39, %v1252_v40 }
 0x24e   :  { %1257 = vst.msk [vmem:[%s2100_s8] sm:$0xff] %vm1256_vm0, %v1255_v44 }
 0x24f   :  { %1262 = vsyncpa [#allocation6], 1 }
 0x250   :  { %1263 = vsyncpa [#allocation8], 1 }
 0x251   :  { %1264 = vsyncpa [#allocation11], 1 }
 0x252   :  { %1265 = vsyncmov [#allocation3] }
 0x255   :  { %s1266_s13 = vpop.sfrf %1265 }
 0x256   :  { %p1665_p0 = scmp.ne.s32.totalorder %s1266_s13, 0 }
 0x258   :  { %1270 = shalt.err (%p1665_p0)  }

</bundles_post_ra>
